<compile_context>
chip_gen: v6e
topology: v6e:2x2x1
jax: 0.10.0
libtpu: 0.0.40
codegen_flags: <defaults>
</compile_context>

<pallas_src>
import functools

import jax
import jax.numpy as jnp
import numpy as np
from jax.experimental import pallas as pl
from jax.experimental.pallas import tpu as pltpu


def _hypernet_kernel(lam_ref, piv_ref, const_ref, out_ref, *, kernel_num):
    """Batched PWNet piecewise-linear interpolation.

    lam_ref  : VMEM (B_tile, 1)   f32  lambdas for this tile
    piv_ref  : SMEM (kernel_num,) f32  trainable pivots
    const_ref: VMEM (K_pad, Np)   f32  knot table (sublane/lane padded)
    out_ref  : VMEM (B_tile, Np)  f32  interpolated parameter rows
    """
    lam = lam_ref[...] * jnp.float32(0.99999)                       # (Bt, 1)
    leftf = jnp.floor(lam * jnp.float32(kernel_num - 1))
    # Clamp so out-of-range lambdas can never index outside the knot table.
    left = jnp.clip(leftf, 0.0, jnp.float32(kernel_num - 2)).astype(jnp.int32)
    right = left + 1                                                # (Bt, 1)

    # Gather pivots[left], pivots[right] per row via a tiny static select chain
    # over SMEM scalars (kernel_num is small and compile-time static).
    piv_l = jnp.zeros_like(lam)
    piv_r = jnp.zeros_like(lam)
    for k in range(kernel_num):
        pk = piv_ref[k]                                             # SMEM scalar
        piv_l = jnp.where(left == k, pk, piv_l)
        piv_r = jnp.where(right == k, pk, piv_r)
    dist = (piv_r - lam) / (piv_r - piv_l)                          # (Bt, 1)

    # out[b, :] = dist[b] * const[left[b], :] + (1 - dist[b]) * const[right[b], :]
    # as a weighted sum over knots: exactly the reference products/sum (non-selected
    # terms contribute exact zeros), pure VPU work on (8, Np) tiles.
    acc = jnp.zeros(out_ref.shape, jnp.float32)
    for k in range(kernel_num):
        w_k = (jnp.where(left == k, dist, 0.0)
               + jnp.where(right == k, 1.0 - dist, 0.0))            # (Bt, 1)
        acc = acc + w_k * const_ref[k:k + 1, :]                     # (Bt,1)*(1,Np)
    out_ref[...] = acc


def make_hypernet_params(hidden_layer_num, hidden_size, out_size1, out_size2,
                         kernel_num, key):
    """Deterministic parameter construction mirroring HyperNet.__init__.

    Returns (const_flat, pivots) with const_flat of shape (kernel_num, O1*O2).
    """
    # TODO(synk): hidden_layer_num > 0 stacks PWNet((hidden, ...)) + ReLU layers whose
    # broadcast-over-hidden semantics are unused for DARTS alpha generation; only
    # hidden_layer_num == 0 is implemented.
    if hidden_layer_num != 0:
        raise NotImplementedError("only hidden_layer_num == 0 is supported")
    out_size = out_size1 * out_size2
    # PWNet((1, out_size), kernel_num), init_='random':
    # kaiming_uniform_(a=sqrt(5)) on each (1, out_size) slice -> U(-b, b), b = 1/sqrt(fan_in).
    bound = 1.0 / np.sqrt(out_size)
    const_flat = jax.random.uniform(key, (kernel_num, out_size), dtype=jnp.float32,
                                    minval=-bound, maxval=bound)
    pivots = jnp.asarray(np.linspace(0.0, 1.0, kernel_num), dtype=jnp.float32)
    return const_flat, pivots


def prepare_const(const_flat):
    """One-time layout plumbing (NOT per forward call):
    (kernel_num, N) -> (K_pad, Np) f32 with K_pad a multiple of 8 sublanes and
    Np a multiple of 128 lanes, so the whole table is one aligned VMEM block and
    output rows are lane-dense."""
    kernel_num, n = const_flat.shape
    k_pad = max(8, ((kernel_num + 7) // 8) * 8)
    n_pad = ((n + 127) // 128) * 128
    const_padded = jnp.zeros((k_pad, n_pad), jnp.float32)
    const_padded = const_padded.at[:kernel_num, :n].set(const_flat.astype(jnp.float32))
    return const_padded


def hypernet_lerp_batched(lams, const_padded, pivots, kernel_num, *, b_tile=8):
    """Core batched pallas_call: (B,) lambdas -> (B_pad, Np) padded alpha rows."""
    lams = jnp.asarray(lams, jnp.float32).reshape(-1)
    b = lams.shape[0]
    b_pad = ((b + b_tile - 1) // b_tile) * b_tile
    lam_col = jnp.zeros((b_pad, 1), jnp.float32).at[:b, 0].set(lams)
    k_pad, n_pad = const_padded.shape

    kernel = functools.partial(_hypernet_kernel, kernel_num=kernel_num)
    out = pl.pallas_call(
        kernel,
        out_shape=jax.ShapeDtypeStruct((b_pad, n_pad), jnp.float32),
        grid=(b_pad // b_tile,),
        in_specs=[
            # Per-tile lambda column.
            pl.BlockSpec((b_tile, 1), lambda i: (i, 0)),
            # Trainable pivots as SMEM scalars.
            pl.BlockSpec(memory_space=pltpu.MemorySpace.SMEM),
            # Whole knot table resident in VMEM (same block every grid step).
            pl.BlockSpec((k_pad, n_pad), lambda i: (0, 0)),
        ],
        out_specs=pl.BlockSpec((b_tile, n_pad), lambda i: (i, 0)),
        compiler_params=pltpu.CompilerParams(dimension_semantics=("parallel",)),
    )(lam_col, pivots.astype(jnp.float32), const_padded)
    return out  # rows >= b are padding


def hypernet_forward_batch(xs, const_padded, pivots, kernel_num, out_size1, out_size2):
    """Batched HyperNet.forward: (B,) lambdas -> (B, out_size1, out_size2) f32."""
    xs = jnp.asarray(xs, jnp.float32).reshape(-1)
    b = xs.shape[0]
    n = out_size1 * out_size2
    out = hypernet_lerp_batched(xs, const_padded, pivots, kernel_num)
    # Layout plumbing back to the module view (fold into the consumer when possible).
    return out[:b, :n].reshape(b, out_size1, out_size2)


def hypernet_forward(x, const_padded, pivots, kernel_num, out_size1, out_size2):
    """Module-semantics HyperNet.forward(x) for a scalar lambda -> (O1, O2) f32."""
    lams = jnp.reshape(jnp.asarray(x, jnp.float32), (1,))
    n = out_size1 * out_size2
    out = hypernet_lerp_batched(lams, const_padded, pivots, kernel_num)
    return out[0, :n].reshape(out_size1, out_size2)


def hypernet_reference(x, const_flat, pivots, out_size1, out_size2):
    """Pure-JAX reference of the PyTorch forward (hidden_layer_num == 0)."""
    kernel_num = const_flat.shape[0]
    lam = jnp.asarray(x, jnp.float32) * 0.99999
    left = jnp.floor(lam * (kernel_num - 1)).astype(jnp.int32)
    right = left + 1
    dist = (pivots[right] - lam) / (pivots[right] - pivots[left])
    res = const_flat[left] * dist + (1.0 - dist) * const_flat[right]
    return res.reshape(out_size1, out_size2).astype(jnp.float32)


if __name__ == "__main__":
    # DARTS-like shapes: 14 edges x 8 ops structure matrix, 5 pivots.
    hidden_layer_num = 0
    hidden_size = 32          # unused when hidden_layer_num == 0
    out_size1, out_size2 = 14, 8
    kernel_num = 5

    key = jax.random.PRNGKey(0)
    kp, kx = jax.random.split(key)
    const_flat, pivots = make_hypernet_params(hidden_layer_num, hidden_size,
                                              out_size1, out_size2, kernel_num, kp)
    const_padded = prepare_const(const_flat)   # one-time layout, not per call

    # Batched path: 8 lambdas (incl. endpoints) -> one kernel call, full vreg rows.
    xs = jnp.concatenate([
        jnp.asarray([0.0, 0.25, 0.5, 0.75, 1.0], jnp.float32),
        jax.random.uniform(kx, (3,), dtype=jnp.float32),
    ])
    batched = jax.jit(hypernet_forward_batch, static_argnums=(3, 4, 5))
    outs = jax.block_until_ready(
        batched(xs, const_padded, pivots, kernel_num, out_size1, out_size2))
    for b in range(xs.shape[0]):
        ref = hypernet_reference(xs[b], const_flat, pivots, out_size1, out_size2)
        np.testing.assert_allclose(np.asarray(outs[b]), np.asarray(ref),
                                   rtol=1e-5, atol=1e-6)

    # Single-lambda (module semantics) path.
    x = jax.random.uniform(jax.random.PRNGKey(1), (), dtype=jnp.float32)
    out1 = jax.block_until_ready(
        hypernet_forward(x, const_padded, pivots, kernel_num, out_size1, out_size2))
    ref1 = hypernet_reference(x, const_flat, pivots, out_size1, out_size2)
    np.testing.assert_allclose(np.asarray(out1), np.asarray(ref1), rtol=1e-5, atol=1e-6)

    print("KERNEL_OK")
</pallas_src>

<mosaic_0001>
module attributes {stable_mosaic.version = 11 : i64} {
  func.func @_hypernet_kernel(%arg0: i32, %arg1: memref<8x1xf32, #tpu.memory_space<vmem>>, %arg2: memref<5xf32, #tpu.memory_space<smem>>, %arg3: memref<8x128xf32, #tpu.memory_space<vmem>>, %arg4: memref<8x128xf32, #tpu.memory_space<vmem>>) attributes {dimension_semantics = [#tpu.dimension_semantics<parallel>], iteration_bounds = array<i64: 1>, scalar_prefetch = 0 : i64, scratch_operands = 0 : i64, tpu.core_type = #tpu.core_type<tc>, window_params = [{transform_indices = @transform_0, window_bounds = array<i64: 8, 1>}, {transform_indices = @transform_1, window_bounds = array<i64: 5>}, {pipeline_mode = #tpu.pipeline_mode<synchronous>, transform_indices = @transform_2, window_bounds = array<i64: 8, 128>}, {transform_indices = @transform_3, window_bounds = array<i64: 8, 128>}]} {
    %c0 = arith.constant 0 : index
    %c0_0 = arith.constant 0 : index
    %0 = vector.load %arg1[%c0, %c0_0] : memref<8x1xf32, #tpu.memory_space<vmem>>, vector<8x1xf32>
    %cst = arith.constant 0.999989986 : f32
    %1 = vector.broadcast %cst : f32 to vector<8x1xf32>
    %2 = arith.mulf %0, %1 : vector<8x1xf32>
    %cst_1 = arith.constant 4.000000e+00 : f32
    %3 = vector.broadcast %cst_1 : f32 to vector<8x1xf32>
    %4 = arith.mulf %2, %3 : vector<8x1xf32>
    %5 = math.floor %4 : vector<8x1xf32>
    %cst_2 = arith.constant 0.000000e+00 : f32
    %cst_3 = arith.constant 3.000000e+00 : f32
    %6 = vector.broadcast %cst_2 : f32 to vector<8x1xf32>
    %7 = arith.maximumf %6, %5 : vector<8x1xf32>
    %8 = vector.broadcast %cst_3 : f32 to vector<8x1xf32>
    %9 = arith.minimumf %8, %7 : vector<8x1xf32>
    %10 = arith.fptosi %9 : vector<8x1xf32> to vector<8x1xi32>
    %c1_i32 = arith.constant 1 : i32
    %11 = vector.broadcast %c1_i32 : i32 to vector<8x1xi32>
    %12 = arith.addi %10, %11 : vector<8x1xi32>
    %cst_4 = arith.constant 0.000000e+00 : f32
    %13 = vector.broadcast %cst_4 : f32 to vector<8x1xf32>
    %cst_5 = arith.constant 0.000000e+00 : f32
    %14 = vector.broadcast %cst_5 : f32 to vector<8x1xf32>
    %c0_6 = arith.constant 0 : index
    %15 = memref.load %arg2[%c0_6] : memref<5xf32, #tpu.memory_space<smem>>
    %c0_i32 = arith.constant 0 : i32
    %16 = vector.broadcast %c0_i32 : i32 to vector<8x1xi32>
    %17 = arith.cmpi eq, %10, %16 : vector<8x1xi32>
    %18 = vector.broadcast %15 : f32 to vector<8x1xf32>
    %19 = arith.select %17, %18, %13 : vector<8x1xi1>, vector<8x1xf32>
    %c0_i32_7 = arith.constant 0 : i32
    %20 = vector.broadcast %c0_i32_7 : i32 to vector<8x1xi32>
    %21 = arith.cmpi eq, %12, %20 : vector<8x1xi32>
    %22 = vector.broadcast %15 : f32 to vector<8x1xf32>
    %23 = arith.select %21, %22, %14 : vector<8x1xi1>, vector<8x1xf32>
    %c1 = arith.constant 1 : index
    %24 = memref.load %arg2[%c1] : memref<5xf32, #tpu.memory_space<smem>>
    %c1_i32_8 = arith.constant 1 : i32
    %25 = vector.broadcast %c1_i32_8 : i32 to vector<8x1xi32>
    %26 = arith.cmpi eq, %10, %25 : vector<8x1xi32>
    %27 = vector.broadcast %24 : f32 to vector<8x1xf32>
    %28 = arith.select %26, %27, %19 : vector<8x1xi1>, vector<8x1xf32>
    %c1_i32_9 = arith.constant 1 : i32
    %29 = vector.broadcast %c1_i32_9 : i32 to vector<8x1xi32>
    %30 = arith.cmpi eq, %12, %29 : vector<8x1xi32>
    %31 = vector.broadcast %24 : f32 to vector<8x1xf32>
    %32 = arith.select %30, %31, %23 : vector<8x1xi1>, vector<8x1xf32>
    %c2 = arith.constant 2 : index
    %33 = memref.load %arg2[%c2] : memref<5xf32, #tpu.memory_space<smem>>
    %c2_i32 = arith.constant 2 : i32
    %34 = vector.broadcast %c2_i32 : i32 to vector<8x1xi32>
    %35 = arith.cmpi eq, %10, %34 : vector<8x1xi32>
    %36 = vector.broadcast %33 : f32 to vector<8x1xf32>
    %37 = arith.select %35, %36, %28 : vector<8x1xi1>, vector<8x1xf32>
    %c2_i32_10 = arith.constant 2 : i32
    %38 = vector.broadcast %c2_i32_10 : i32 to vector<8x1xi32>
    %39 = arith.cmpi eq, %12, %38 : vector<8x1xi32>
    %40 = vector.broadcast %33 : f32 to vector<8x1xf32>
    %41 = arith.select %39, %40, %32 : vector<8x1xi1>, vector<8x1xf32>
    %c3 = arith.constant 3 : index
    %42 = memref.load %arg2[%c3] : memref<5xf32, #tpu.memory_space<smem>>
    %c3_i32 = arith.constant 3 : i32
    %43 = vector.broadcast %c3_i32 : i32 to vector<8x1xi32>
    %44 = arith.cmpi eq, %10, %43 : vector<8x1xi32>
    %45 = vector.broadcast %42 : f32 to vector<8x1xf32>
    %46 = arith.select %44, %45, %37 : vector<8x1xi1>, vector<8x1xf32>
    %c3_i32_11 = arith.constant 3 : i32
    %47 = vector.broadcast %c3_i32_11 : i32 to vector<8x1xi32>
    %48 = arith.cmpi eq, %12, %47 : vector<8x1xi32>
    %49 = vector.broadcast %42 : f32 to vector<8x1xf32>
    %50 = arith.select %48, %49, %41 : vector<8x1xi1>, vector<8x1xf32>
    %c4 = arith.constant 4 : index
    %51 = memref.load %arg2[%c4] : memref<5xf32, #tpu.memory_space<smem>>
    %c4_i32 = arith.constant 4 : i32
    %52 = vector.broadcast %c4_i32 : i32 to vector<8x1xi32>
    %53 = arith.cmpi eq, %10, %52 : vector<8x1xi32>
    %54 = vector.broadcast %51 : f32 to vector<8x1xf32>
    %55 = arith.select %53, %54, %46 : vector<8x1xi1>, vector<8x1xf32>
    %c4_i32_12 = arith.constant 4 : i32
    %56 = vector.broadcast %c4_i32_12 : i32 to vector<8x1xi32>
    %57 = arith.cmpi eq, %12, %56 : vector<8x1xi32>
    %58 = vector.broadcast %51 : f32 to vector<8x1xf32>
    %59 = arith.select %57, %58, %50 : vector<8x1xi1>, vector<8x1xf32>
    %60 = arith.subf %59, %2 : vector<8x1xf32>
    %61 = arith.subf %59, %55 : vector<8x1xf32>
    %62 = arith.divf %60, %61 : vector<8x1xf32>
    %cst_13 = arith.constant 0.000000e+00 : f32
    %63 = vector.broadcast %cst_13 : f32 to vector<8x128xf32>
    %c0_i32_14 = arith.constant 0 : i32
    %64 = vector.broadcast %c0_i32_14 : i32 to vector<8x1xi32>
    %65 = arith.cmpi eq, %10, %64 : vector<8x1xi32>
    %cst_15 = arith.constant 0.000000e+00 : f32
    %66 = vector.broadcast %cst_15 : f32 to vector<8x1xf32>
    %67 = arith.select %65, %62, %66 : vector<8x1xi1>, vector<8x1xf32>
    %c0_i32_16 = arith.constant 0 : i32
    %68 = vector.broadcast %c0_i32_16 : i32 to vector<8x1xi32>
    %69 = arith.cmpi eq, %12, %68 : vector<8x1xi32>
    %cst_17 = arith.constant 1.000000e+00 : f32
    %70 = vector.broadcast %cst_17 : f32 to vector<8x1xf32>
    %71 = arith.subf %70, %62 : vector<8x1xf32>
    %cst_18 = arith.constant 0.000000e+00 : f32
    %72 = vector.broadcast %cst_18 : f32 to vector<8x1xf32>
    %73 = arith.select %69, %71, %72 : vector<8x1xi1>, vector<8x1xf32>
    %74 = arith.addf %67, %73 : vector<8x1xf32>
    %c0_19 = arith.constant 0 : index
    %c0_20 = arith.constant 0 : index
    %75 = vector.load %arg3[%c0_19, %c0_20] : memref<8x128xf32, #tpu.memory_space<vmem>>, vector<1x128xf32>
    %76 = vector.broadcast %74 : vector<8x1xf32> to vector<8x128xf32>
    %77 = vector.broadcast %75 : vector<1x128xf32> to vector<8x128xf32>
    %78 = arith.mulf %76, %77 : vector<8x128xf32>
    %79 = arith.addf %63, %78 : vector<8x128xf32>
    %c1_i32_21 = arith.constant 1 : i32
    %80 = vector.broadcast %c1_i32_21 : i32 to vector<8x1xi32>
    %81 = arith.cmpi eq, %10, %80 : vector<8x1xi32>
    %cst_22 = arith.constant 0.000000e+00 : f32
    %82 = vector.broadcast %cst_22 : f32 to vector<8x1xf32>
    %83 = arith.select %81, %62, %82 : vector<8x1xi1>, vector<8x1xf32>
    %c1_i32_23 = arith.constant 1 : i32
    %84 = vector.broadcast %c1_i32_23 : i32 to vector<8x1xi32>
    %85 = arith.cmpi eq, %12, %84 : vector<8x1xi32>
    %cst_24 = arith.constant 1.000000e+00 : f32
    %86 = vector.broadcast %cst_24 : f32 to vector<8x1xf32>
    %87 = arith.subf %86, %62 : vector<8x1xf32>
    %cst_25 = arith.constant 0.000000e+00 : f32
    %88 = vector.broadcast %cst_25 : f32 to vector<8x1xf32>
    %89 = arith.select %85, %87, %88 : vector<8x1xi1>, vector<8x1xf32>
    %90 = arith.addf %83, %89 : vector<8x1xf32>
    %c1_26 = arith.constant 1 : index
    %c0_27 = arith.constant 0 : index
    %91 = vector.load %arg3[%c1_26, %c0_27] : memref<8x128xf32, #tpu.memory_space<vmem>>, vector<1x128xf32>
    %92 = vector.broadcast %90 : vector<8x1xf32> to vector<8x128xf32>
    %93 = vector.broadcast %91 : vector<1x128xf32> to vector<8x128xf32>
    %94 = arith.mulf %92, %93 : vector<8x128xf32>
    %95 = arith.addf %79, %94 : vector<8x128xf32>
    %c2_i32_28 = arith.constant 2 : i32
    %96 = vector.broadcast %c2_i32_28 : i32 to vector<8x1xi32>
    %97 = arith.cmpi eq, %10, %96 : vector<8x1xi32>
    %cst_29 = arith.constant 0.000000e+00 : f32
    %98 = vector.broadcast %cst_29 : f32 to vector<8x1xf32>
    %99 = arith.select %97, %62, %98 : vector<8x1xi1>, vector<8x1xf32>
    %c2_i32_30 = arith.constant 2 : i32
    %100 = vector.broadcast %c2_i32_30 : i32 to vector<8x1xi32>
    %101 = arith.cmpi eq, %12, %100 : vector<8x1xi32>
    %cst_31 = arith.constant 1.000000e+00 : f32
    %102 = vector.broadcast %cst_31 : f32 to vector<8x1xf32>
    %103 = arith.subf %102, %62 : vector<8x1xf32>
    %cst_32 = arith.constant 0.000000e+00 : f32
    %104 = vector.broadcast %cst_32 : f32 to vector<8x1xf32>
    %105 = arith.select %101, %103, %104 : vector<8x1xi1>, vector<8x1xf32>
    %106 = arith.addf %99, %105 : vector<8x1xf32>
    %c2_33 = arith.constant 2 : index
    %c0_34 = arith.constant 0 : index
    %107 = vector.load %arg3[%c2_33, %c0_34] : memref<8x128xf32, #tpu.memory_space<vmem>>, vector<1x128xf32>
    %108 = vector.broadcast %106 : vector<8x1xf32> to vector<8x128xf32>
    %109 = vector.broadcast %107 : vector<1x128xf32> to vector<8x128xf32>
    %110 = arith.mulf %108, %109 : vector<8x128xf32>
    %111 = arith.addf %95, %110 : vector<8x128xf32>
    %c3_i32_35 = arith.constant 3 : i32
    %112 = vector.broadcast %c3_i32_35 : i32 to vector<8x1xi32>
    %113 = arith.cmpi eq, %10, %112 : vector<8x1xi32>
    %cst_36 = arith.constant 0.000000e+00 : f32
    %114 = vector.broadcast %cst_36 : f32 to vector<8x1xf32>
    %115 = arith.select %113, %62, %114 : vector<8x1xi1>, vector<8x1xf32>
    %c3_i32_37 = arith.constant 3 : i32
    %116 = vector.broadcast %c3_i32_37 : i32 to vector<8x1xi32>
    %117 = arith.cmpi eq, %12, %116 : vector<8x1xi32>
    %cst_38 = arith.constant 1.000000e+00 : f32
    %118 = vector.broadcast %cst_38 : f32 to vector<8x1xf32>
    %119 = arith.subf %118, %62 : vector<8x1xf32>
    %cst_39 = arith.constant 0.000000e+00 : f32
    %120 = vector.broadcast %cst_39 : f32 to vector<8x1xf32>
    %121 = arith.select %117, %119, %120 : vector<8x1xi1>, vector<8x1xf32>
    %122 = arith.addf %115, %121 : vector<8x1xf32>
    %c3_40 = arith.constant 3 : index
    %c0_41 = arith.constant 0 : index
    %123 = vector.load %arg3[%c3_40, %c0_41] : memref<8x128xf32, #tpu.memory_space<vmem>>, vector<1x128xf32>
    %124 = vector.broadcast %122 : vector<8x1xf32> to vector<8x128xf32>
    %125 = vector.broadcast %123 : vector<1x128xf32> to vector<8x128xf32>
    %126 = arith.mulf %124, %125 : vector<8x128xf32>
    %127 = arith.addf %111, %126 : vector<8x128xf32>
    %c4_i32_42 = arith.constant 4 : i32
    %128 = vector.broadcast %c4_i32_42 : i32 to vector<8x1xi32>
    %129 = arith.cmpi eq, %10, %128 : vector<8x1xi32>
    %cst_43 = arith.constant 0.000000e+00 : f32
    %130 = vector.broadcast %cst_43 : f32 to vector<8x1xf32>
    %131 = arith.select %129, %62, %130 : vector<8x1xi1>, vector<8x1xf32>
    %c4_i32_44 = arith.constant 4 : i32
    %132 = vector.broadcast %c4_i32_44 : i32 to vector<8x1xi32>
    %133 = arith.cmpi eq, %12, %132 : vector<8x1xi32>
    %cst_45 = arith.constant 1.000000e+00 : f32
    %134 = vector.broadcast %cst_45 : f32 to vector<8x1xf32>
    %135 = arith.subf %134, %62 : vector<8x1xf32>
    %cst_46 = arith.constant 0.000000e+00 : f32
    %136 = vector.broadcast %cst_46 : f32 to vector<8x1xf32>
    %137 = arith.select %133, %135, %136 : vector<8x1xi1>, vector<8x1xf32>
    %138 = arith.addf %131, %137 : vector<8x1xf32>
    %c4_47 = arith.constant 4 : index
    %c0_48 = arith.constant 0 : index
    %139 = vector.load %arg3[%c4_47, %c0_48] : memref<8x128xf32, #tpu.memory_space<vmem>>, vector<1x128xf32>
    %140 = vector.broadcast %138 : vector<8x1xf32> to vector<8x128xf32>
    %141 = vector.broadcast %139 : vector<1x128xf32> to vector<8x128xf32>
    %142 = arith.mulf %140, %141 : vector<8x128xf32>
    %143 = arith.addf %127, %142 : vector<8x128xf32>
    %c0_49 = arith.constant 0 : index
    %c0_50 = arith.constant 0 : index
    %144 = vector.load %arg4[%c0_49, %c0_50] : memref<8x128xf32, #tpu.memory_space<vmem>>, vector<8x128xf32>
    tpu.vector_store %arg4[%c0_49, %c0_50], %143 {strides = array<i32>} : memref<8x128xf32, #tpu.memory_space<vmem>>, vector<8x128xf32>,
    return
  }
  func.func @transform_0(%arg0: i32) -> (i32, i32) {
    %c0_i32 = arith.constant 0 : i32
    %c0_i32_0 = arith.constant 0 : i32
    return %arg0, %c0_i32 : i32, i32
  }
  func.func @transform_1(%arg0: i32) -> i32 {
    %c0_i32 = arith.constant 0 : i32
    %c0_i32_0 = arith.constant 0 : i32
    return %c0_i32 : i32
  }
  func.func @transform_2(%arg0: i32) -> (i32, i32) {
    %c0_i32 = arith.constant 0 : i32
    %c0_i32_0 = arith.constant 0 : i32
    %c0_i32_1 = arith.constant 0 : i32
    return %c0_i32, %c0_i32_0 : i32, i32
  }
  func.func @transform_3(%arg0: i32) -> (i32, i32) {
    %c0_i32 = arith.constant 0 : i32
    %c0_i32_0 = arith.constant 0 : i32
    return %arg0, %c0_i32 : i32, i32
  }
}

</mosaic_0001>

<bundles_post_ra>
// kernel: hypernet_forward_batch.1
= control target key start
LH: loop header
LB: loop body
LE: loop exit
PB: predicated region body
PF: predicated region fallthrough
CT: control target
= control target key end

     0   :  { %8 = vsyncpa [#allocation3], 0  ;;  %s248_s0 = inlined_call_operand.vmem [shape: f32[8,1], index: 0, kind: input, shape index: {}]   ;;  %s249_s1 = inlined_call_operand.vmem [shape: f32[5], index: 1, kind: input, shape index: {}]   ;;  %s250_s2 = inlined_call_operand.vmem [shape: f32[8,128], index: 2, kind: input, shape index: {}]   ;;  %s251_s3 = inlined_call_operand.vmem [shape: f32[8,128], index: 3, kind: output, shape index: {}]  }
   0x1   :  { %s17_s14 = sshll.u32 %s249_s1, 4  ;;  %s18_s14 = int_to_ptr.vmem [resolvable:$true] %s17_s14 }
   0x2   :  { %s168_s15 = scalar_lea.vmem %s18_s14, 16  ;;  %p173_p1 = scmp.lt.s32.totalorder %s18_s14, %s18_s14 }
   0x3   :  { %p169_p0 = scmp.ne.s32.totalorder %s18_s14, %s168_s15  ;;  %p174_p2 = scmp.lt.s32.totalorder %s168_s15, %s168_s15 }
   0x5   :  { %p175_p3 = por %p174_p2, %p173_p1 }
   0x7   :  { %p176_p4 = pnand %p175_p3, %p169_p0 }
   0x9   :  { %179 = shalt.err (!%p176_p4)
}
   0xa   :  { %s182_s16 = smov [#allocation2]  }
   0xb   :  { %20 = dma.vmem_to_smem %s18_s14, 16, %s182_s16, [#allocation3]  }
   0xc   :  { %180 = dma.done.wait [#allocation3], 16  }
   0xd   :  { %181 = vsyncadd [#allocation3], 4294967280 }
   0xe   :  { %26 = sfence }
   0xf   :  { %v27_v0 = vld [vmem:[%s248_s0] sm:$0xff]  ;;  %v183_v1 = vmov 0   ;;  %s35_s1 = sld [smem:[#allocation2]] }
  0x10   :  { %165 = vset.pattern.permute.xlu1 %v183_v1  ;;  %164 = vset.pattern.permute.xlu0 %v183_v1  ;;  %v28_v2 = vmul.f32 0.99999, %v27_v0  ;;  %s151_s19 = sld [smem:[#allocation2 + $0x1]]  ;;  %v155_v47 = vld [vmem:[%s250_s2] ss:$0 sm:$0xff] }
  0x11   :  { %s152_s20 = sld [smem:[#allocation2 + $0x2]]  ;;  %v156_v48 = vld [vmem:[%s250_s2 + $0x1] ss:$0 sm:$0xff]  ;;  %v157_v49 = vld [vmem:[%s250_s2 + $0x2] ss:$0 sm:$0xff] }
  0x12   :  { %v29_v3 = vmul.f32 4.0, %v28_v2  ;;  %s153_s21 = sld [smem:[#allocation2 + $0x3]]  ;;  %v158_v53 = vld [vmem:[%s250_s2 + $0x3] ss:$0 sm:$0xff]  ;;  %v159_v57 = vld [vmem:[%s250_s2 + $0x4] ss:$0 sm:$0xff] }
  0x13   :  { %s154_s22 = sld [smem:[#allocation2 + $0x4]] }
  0x14   :  { %v30_v4 = vfloor.f32 %v29_v3 }
  0x15   :  { %v37_v9 = vstv %s35_s1 }
  0x16   :  { %v31_v5 = vmax.f32 %v30_v4, 0.0  ;;  %v43_v10 = vstv %s151_s19 }
  0x17   :  { %v49_v11 = vstv %s152_s20 }
  0x18   :  { %v32_v6 = vmin.f32 %v31_v5, 3.0  ;;  %v55_v12 = vstv %s153_s21 }
  0x19   :  { %v61_v15 = vstv %s154_s22 }
  0x1a   :  { %v160_v7 = vtrunc.f32 %v32_v6 }
  0x1c   :  { %v161_v8 = vcvt.f32.s32 %v160_v7 }
  0x1e   :  { %v34_v13 = vadd.s32 1, %v161_v8  ;;  %vm36_vm0 = vcmp.eq.s32.totalorder %v161_v8, 0  ;;  %vm42_vm1 = vcmp.eq.s32.totalorder %v161_v8, 1  ;;  %vm48_vm2 = vcmp.eq.s32.totalorder %v161_v8, 2 }
  0x1f   :  { %v38_v14 = vsel %vm36_vm0, %v37_v9, 0.0  ;;  %vm54_vm3 = vcmp.eq.s32.totalorder %v161_v8, 3  ;;  %vm60_vm4 = vcmp.eq.s32.totalorder %v161_v8, 4 }
  0x20   :  { %vm39_vm5 = vcmp.eq.s32.totalorder %v34_v13, 0  ;;  %v44_v16 = vsel %vm42_vm1, %v43_v10, %v38_v14  ;;  %vm45_vm6 = vcmp.eq.s32.totalorder %v34_v13, 1  ;;  %vm51_vm7 = vcmp.eq.s32.totalorder %v34_v13, 2 }
  0x21   :  { %v40_v17 = vsel %vm39_vm5, %v37_v9, 0.0  ;;  %v50_v18 = vsel %vm48_vm2, %v49_v11, %v44_v16  ;;  %vm57_vm8 = vcmp.eq.s32.totalorder %v34_v13, 3  ;;  %vm63_vm9 = vcmp.eq.s32.totalorder %v34_v13, 4 }
  0x22   :  { %v46_v19 = vsel %vm45_vm6, %v43_v10, %v40_v17  ;;  %v56_v20 = vsel %vm54_vm3, %v55_v12, %v50_v18 }
  0x23   :  { %v52_v21 = vsel %vm51_vm7, %v49_v11, %v46_v19  ;;  %v62_v22 = vsel %vm60_vm4, %v61_v15, %v56_v20 }
  0x24   :  { %v58_v23 = vsel %vm57_vm8, %v55_v12, %v52_v21 }
  0x25   :  { %v64_v24 = vsel %vm63_vm9, %v61_v15, %v58_v23 }
  0x26   :  { %v66_v25 = vsub.f32 %v64_v24, %v62_v22  ;;  %v65_v26 = vsub.f32 %v64_v24, %v28_v2 }
  0x28   :  { %166 = vrcp.f32 %v66_v25 }
  0x35   :  { %v167_v27 = vpop.eup %166 }
  0x36   :  { %v68_v28 = vmul.f32 %v167_v27, %v65_v26 }
  0x38   :  { %v70_v29 = vsub.f32 1.0, %v68_v28  ;;  %v100_v30 = vsel %vm48_vm2, %v68_v28, 0.0  ;;  %v69_v31 = vsel %vm36_vm0, %v68_v28, 0.0  ;;  %v115_v32 = vsel %vm54_vm3, %v68_v28, 0.0 }
  0x39   :  { %v85_v33 = vsel %vm42_vm1, %v68_v28, 0.0  ;;  %v130_v42 = vsel %vm60_vm4, %v68_v28, 0.0 }
  0x3a   :  { %v101_v34 = vsel %vm51_vm7, %v70_v29, 0.0  ;;  %v71_v35 = vsel %vm39_vm5, %v70_v29, 0.0  ;;  %v116_v36 = vsel %vm57_vm8, %v70_v29, 0.0  ;;  %v86_v37 = vsel %vm45_vm6, %v70_v29, 0.0 }
  0x3b   :  { %v102_v38 = vadd.f32 %v101_v34, %v100_v30  ;;  %v72_v39 = vadd.f32 %v71_v35, %v69_v31  ;;  %v117_v40 = vadd.f32 %v116_v36, %v115_v32  ;;  %v87_v41 = vadd.f32 %v86_v37, %v85_v33 }
  0x3c   :  { %v131_v43 = vsel %vm63_vm9, %v70_v29, 0.0 }
  0x3d   :  { %106 = vperm.xlu1 %165, %v102_v38   ;;  %76 = vperm.xlu0 %164, %v72_v39   ;;  %v132_v44 = vadd.f32 %v131_v43, %v130_v42 }
  0x41   :  { %121 = vperm.xlu1 %165, %v117_v40   ;;  %91 = vperm.xlu0 %164, %v87_v41  }
  0x45   :  { %136 = vperm.xlu0 %164, %v132_v44  }
  0xb8   :  { %v107_v45 = vpop.permute.xlu1 %106  ;;  %v77_v46 = vpop.permute.xlu0 %76 }
  0xb9   :  { %v83_v51 = vmul.f32 %v155_v47, %v77_v46  ;;  %v113_v55 = vmul.f32 %v157_v49, %v107_v45 }
  0xbc   :  { %v92_v50 = vpop.permute.xlu0 %91  ;;  %v122_v54 = vpop.permute.xlu1 %121 }
  0xbd   :  { %v98_v52 = vmul.f32 %v156_v48, %v92_v50  ;;  %v128_v59 = vmul.f32 %v158_v53, %v122_v54 }
  0xbf   :  { %v99_v56 = vadd.f32 %v98_v52, %v83_v51 }
  0xc0   :  { %v137_v58 = vpop.permute.xlu0 %136 }
  0xc1   :  { %v114_v60 = vadd.f32 %v113_v55, %v99_v56  ;;  %v143_v62 = vmul.f32 %v159_v57, %v137_v58 }
  0xc3   :  { %v129_v61 = vadd.f32 %v128_v59, %v114_v60 }
  0xc5   :  { %v144_v63 = vadd.f32 %v143_v62, %v129_v61 }
  0xc7   :  { %145 = vst [vmem:[%s251_s3] sm:$0xff] %v144_v63 }
  0xc8   :  { %150 = vsyncpa [#allocation3], 1 }

</bundles_post_ra>
